<compile_context>
chip_gen: v5e
topology: v5e:2x2
jax: 0.10.0
libtpu: 0.0.40
codegen_flags: <defaults>
</compile_context>

<pallas_src>
import jax
import jax.numpy as jnp
from jax.experimental import pallas as pl
from jax.experimental.pallas import tpu as pltpu

_X_TILE_BYTES = 4 * 1024 * 1024      # ~4 MiB packed-x tile per grid step
_MAX_WEIGHT_BYTES = 4 * 1024 * 1024  # cap on the block-diagonal packed weight


def _round_up(v, mult):
    return ((v + mult - 1) // mult) * mult


def _head_kernel(x_ref, w_ref, b_ref, mask_ref, out_ref):
    # x_ref: (tile_rows, K*p), w_ref: (K*p, N*p) block-diagonal,
    # b_ref / mask_ref: (1, N*p), out_ref: (tile_rows, N*p)
    y = jnp.dot(x_ref[...], w_ref[...], preferred_element_type=jnp.float32)
    y = y + b_ref[...]  # bias broadcast over rows (f32)
    out_ref[...] = jnp.where(
        mask_ref[...] != 0, jax.nn.sigmoid(y), jnp.maximum(y, 0.0)
    ).astype(out_ref.dtype)


def no_view_dir_head(x, view_dirs, weight, bias):
    """x: (..., n_input). view_dirs: unused (kept for API parity).

    weight: (n_output, n_input)  (torch nn.Linear layout)
    bias:   (n_output,)
    Returns (rgb, sigma) with shapes (..., 3) and (...,).
    """
    del view_dirs  # NoViewDirHead ignores view directions
    n_output, n_input = weight.shape
    lead_shape = x.shape[:-1]
    m = 1
    for d in lead_shape:
        m *= d

    # Keep bf16 inputs bf16 (halves HBM reads on a read-bound kernel);
    # everything else runs in f32.  MXU accumulates in f32 either way.
    compute_dtype = jnp.bfloat16 if x.dtype == jnp.bfloat16 else jnp.float32
    out_dtype = compute_dtype
    itemsize = jnp.dtype(compute_dtype).itemsize
    x2d = x.reshape(m, n_input).astype(compute_dtype)

    # Row->lane packing factor: make the output block 128-lane dense.
    p = 128 // n_output if (n_output > 0 and 128 % n_output == 0) else 1
    while p > 1 and (n_input * p) * (n_output * p) * itemsize > _MAX_WEIGHT_BYTES:
        p //= 2
    kp = n_input * p
    np_ = n_output * p

    # Pad only the <= p-1 rows the packing reshape needs, then fold p rows
    # into the lane axis (row-major contiguous -> free reshape).
    m_pad = _round_up(max(m, 1), p)
    if m_pad != m:
        x2d = jnp.pad(x2d, ((0, m_pad - m), (0, 0)))
    m_packed = m_pad // p
    x_packed = x2d.reshape(m_packed, kp)

    # Block-diagonal weight, tiled bias, constant activation mask.
    w_t = weight.T.astype(compute_dtype)                              # (K, N)
    w_bd = jnp.kron(jnp.eye(p, dtype=compute_dtype), w_t)             # (K*p, N*p)
    b_row = jnp.tile(bias.astype(jnp.float32), p).reshape(1, np_)     # (1, N*p)
    mask = ((jnp.arange(np_, dtype=jnp.int32) % n_output) < 3)
    mask = mask.astype(jnp.int32).reshape(1, np_)                     # (1, N*p)

    # Row tiling: ~4 MiB packed-x tiles (double-buffered stays under the
    # 16 MiB v5e scoped-VMEM default); keep >= 2 grid steps when possible so
    # both v7x TensorCores get work on the "parallel" axis.
    bytes_per_row = kp * itemsize
    max_tile_rows = max(8, ((_X_TILE_BYTES // bytes_per_row) // 8) * 8)
    if m_packed <= 8:
        tile_rows = m_packed                 # single (full-extent) block
    else:
        want_tiles = max(2, pl.cdiv(m_packed, max_tile_rows))
        tile_rows = min(max_tile_rows,
                        _round_up(pl.cdiv(m_packed, want_tiles), 8))
    num_tiles = pl.cdiv(m_packed, tile_rows)

    cost = pl.CostEstimate(
        flops=2 * num_tiles * tile_rows * kp * np_,
        transcendentals=num_tiles * tile_rows * np_,
        bytes_accessed=(
            m_packed * kp * itemsize          # x read
            + m_packed * np_ * itemsize       # activated output write
            + kp * np_ * itemsize             # block-diag weight (once)
            + 2 * np_ * 4                     # bias + mask (once)
        ),
    )

    out_packed = pl.pallas_call(
        _head_kernel,
        out_shape=jax.ShapeDtypeStruct((m_packed, np_), out_dtype),
        grid=(num_tiles,),
        in_specs=[
            # x: one lane-dense row-tile per grid step (double-buffered DMA).
            pl.BlockSpec((tile_rows, kp), lambda i: (i, 0)),
            # Weight / bias / mask: constant index maps -> VMEM-resident.
            pl.BlockSpec((kp, np_), lambda i: (0, 0)),
            pl.BlockSpec((1, np_), lambda i: (0, 0)),
            pl.BlockSpec((1, np_), lambda i: (0, 0)),
        ],
        out_specs=pl.BlockSpec((tile_rows, np_), lambda i: (i, 0)),
        compiler_params=pltpu.CompilerParams(
            dimension_semantics=("parallel",),
        ),
        cost_estimate=cost,
    )(x_packed, w_bd, b_row, mask)

    out2d = out_packed.reshape(m_pad, n_output)[:m]
    rgb = out2d[:, 0:3].astype(out_dtype).reshape(*lead_shape, 3)
    sigma = out2d[:, 3].astype(out_dtype).reshape(lead_shape)
    return rgb, sigma


if __name__ == "__main__":
    key = jax.random.PRNGKey(0)
    k_x, k_vd, k_w, k_b = jax.random.split(key, 4)

    batch, seq = 2, 8
    n_input, n_output = 32, 4

    x = jax.random.normal(k_x, (batch, seq, n_input), dtype=jnp.float32)
    view_dirs = jax.random.normal(k_vd, (batch, seq, 3), dtype=jnp.float32)

    # Deterministic parameter init (torch nn.Linear-style uniform bound).
    bound = 1.0 / jnp.sqrt(jnp.float32(n_input))
    weight = jax.random.uniform(
        k_w, (n_output, n_input), minval=-bound, maxval=bound, dtype=jnp.float32
    )
    bias = jax.random.uniform(
        k_b, (n_output,), minval=-bound, maxval=bound, dtype=jnp.float32
    )

    rgb, sigma = no_view_dir_head(x, view_dirs, weight, bias)
    jax.block_until_ready((rgb, sigma))

    # Reference check in plain JAX.
    y_ref = x @ weight.T + bias
    rgb_ref = jax.nn.sigmoid(y_ref[..., :3])
    sigma_ref = jnp.maximum(y_ref[..., 3], 0.0)
    assert rgb.shape == (batch, seq, 3) and sigma.shape == (batch, seq)
    assert jnp.allclose(rgb, rgb_ref, atol=1e-5)
    assert jnp.allclose(sigma, sigma_ref, atol=1e-5)

    print("KERNEL_OK")
</pallas_src>

<mosaic_0001>
module attributes {stable_mosaic.version = 11 : i64} {
  func.func @_head_kernel(%arg0: i32, %arg1: memref<1x1024xf32, #tpu.memory_space<vmem>>, %arg2: memref<1024x128xf32, #tpu.memory_space<vmem>>, %arg3: memref<1x128xf32, #tpu.memory_space<vmem>>, %arg4: memref<1x128xi32, #tpu.memory_space<vmem>>, %arg5: memref<1x128xf32, #tpu.memory_space<vmem>>) attributes {dimension_semantics = [#tpu.dimension_semantics<parallel>], iteration_bounds = array<i64: 1>, scalar_prefetch = 0 : i64, scratch_operands = 0 : i64, tpu.core_type = #tpu.core_type<tc>, window_params = [{transform_indices = @transform_0, window_bounds = array<i64: 1, 1024>}, {pipeline_mode = #tpu.pipeline_mode<synchronous>, transform_indices = @transform_1, window_bounds = array<i64: 1024, 128>}, {pipeline_mode = #tpu.pipeline_mode<synchronous>, transform_indices = @transform_2, window_bounds = array<i64: 1, 128>}, {pipeline_mode = #tpu.pipeline_mode<synchronous>, transform_indices = @transform_3, window_bounds = array<i64: 1, 128>}, {transform_indices = @transform_4, window_bounds = array<i64: 1, 128>}]} {
    %c0 = arith.constant 0 : index
    %c0_0 = arith.constant 0 : index
    %0 = vector.load %arg1[%c0, %c0_0] : memref<1x1024xf32, #tpu.memory_space<vmem>>, vector<1x1024xf32>
    %c0_1 = arith.constant 0 : index
    %c0_2 = arith.constant 0 : index
    %1 = vector.load %arg2[%c0_1, %c0_2] : memref<1024x128xf32, #tpu.memory_space<vmem>>, vector<1024x128xf32>
    %cst = arith.constant dense<0.000000e+00> : vector<1x128xf32>
    %2 = tpu.matmul %0, %1, %cst {dimension_numbers = #tpu.dot_dimension_numbers<[1], [0], [0], [1], [0, 0, 1, 1], [], []>} : vector<1x1024xf32>, vector<1024x128xf32>, vector<1x128xf32> -> vector<1x128xf32>
    %c0_3 = arith.constant 0 : index
    %c0_4 = arith.constant 0 : index
    %3 = vector.load %arg3[%c0_3, %c0_4] : memref<1x128xf32, #tpu.memory_space<vmem>>, vector<1x128xf32>
    %4 = arith.addf %2, %3 : vector<1x128xf32>
    %c0_5 = arith.constant 0 : index
    %c0_6 = arith.constant 0 : index
    %5 = vector.load %arg4[%c0_5, %c0_6] : memref<1x128xi32, #tpu.memory_space<vmem>>, vector<1x128xi32>
    %c0_i32 = arith.constant 0 : i32
    %6 = vector.broadcast %c0_i32 : i32 to vector<1x128xi32>
    %7 = arith.cmpi ne, %5, %6 : vector<1x128xi32>
    %8 = arith.negf %4 : vector<1x128xf32>
    %9 = math.exp %8 : vector<1x128xf32>
    %cst_7 = arith.constant 1.000000e+00 : f32
    %10 = vector.broadcast %cst_7 : f32 to vector<1x128xf32>
    %11 = arith.addf %10, %9 : vector<1x128xf32>
    %12 = arith.divf %10, %11 : vector<1x128xf32>
    %cst_8 = arith.constant 0.000000e+00 : f32
    %13 = vector.broadcast %cst_8 : f32 to vector<1x128xf32>
    %14 = arith.maximumf %4, %13 : vector<1x128xf32>
    %15 = arith.select %7, %12, %14 : vector<1x128xi1>, vector<1x128xf32>
    %c0_9 = arith.constant 0 : index
    %c0_10 = arith.constant 0 : index
    %16 = vector.load %arg5[%c0_9, %c0_10] : memref<1x128xf32, #tpu.memory_space<vmem>>, vector<1x128xf32>
    tpu.vector_store %arg5[%c0_9, %c0_10], %15 {strides = array<i32>} : memref<1x128xf32, #tpu.memory_space<vmem>>, vector<1x128xf32>,
    return
  }
  func.func @transform_0(%arg0: i32) -> (i32, i32) {
    %c0_i32 = arith.constant 0 : i32
    %c0_i32_0 = arith.constant 0 : i32
    return %arg0, %c0_i32 : i32, i32
  }
  func.func @transform_1(%arg0: i32) -> (i32, i32) {
    %c0_i32 = arith.constant 0 : i32
    %c0_i32_0 = arith.constant 0 : i32
    %c0_i32_1 = arith.constant 0 : i32
    return %c0_i32, %c0_i32_0 : i32, i32
  }
  func.func @transform_2(%arg0: i32) -> (i32, i32) {
    %c0_i32 = arith.constant 0 : i32
    %c0_i32_0 = arith.constant 0 : i32
    %c0_i32_1 = arith.constant 0 : i32
    return %c0_i32, %c0_i32_0 : i32, i32
  }
  func.func @transform_3(%arg0: i32) -> (i32, i32) {
    %c0_i32 = arith.constant 0 : i32
    %c0_i32_0 = arith.constant 0 : i32
    %c0_i32_1 = arith.constant 0 : i32
    return %c0_i32, %c0_i32_0 : i32, i32
  }
  func.func @transform_4(%arg0: i32) -> (i32, i32) {
    %c0_i32 = arith.constant 0 : i32
    %c0_i32_0 = arith.constant 0 : i32
    return %arg0, %c0_i32 : i32, i32
  }
}

</mosaic_0001>

<bundles_post_ra>
// kernel: tpu_custom_call.1
= control target key start
LH: loop header
LB: loop body
LE: loop exit
PB: predicated region body
PF: predicated region fallthrough
CT: control target
= control target key end

     0   :  { %9 = vsyncpa [#allocation3], 0  ;;  %s540_s0 = inlined_call_operand.hbm [shape: f32[1,1024], index: 0, kind: input, shape index: {}]   ;;  %s541_s1 = inlined_call_operand.hbm [shape: f32[1024,128], index: 1, kind: input, shape index: {}]   ;;  %s542_s2 = inlined_call_operand.vmem [shape: f32[1,128], index: 2, kind: input, shape index: {}]   ;;  %s543_s3 = inlined_call_operand.vmem [shape: s32[1,128], index: 3, kind: input, shape index: {}]   ;;  %s544_s4 = inlined_call_operand.hbm [shape: f32[1,128], index: 4, kind: output, shape index: {}]  }
   0x1   :  { %10 = vsyncpa [#allocation6], 0 }
   0x2   :  { %11 = vsyncpa [#allocation4], 0  ;;  %s17_s17 = sshll.u32 %s540_s0, 4  ;;  %s485_s18 = smov [#allocation2]   ;;  %s18_s17 = int_to_ptr.hbm [resolvable:$true] %s17_s17 }
   0x3   :  { %s19_s19 = sshll.u32 %s485_s18, 4  ;;  %s27_s22 = sshll.u32 %s541_s1, 4  ;;  %s20_s19 = int_to_ptr.vmem [resolvable:$true] %s19_s19  ;;  %s28_s22 = int_to_ptr.hbm [resolvable:$true] %s27_s22 }
   0x4   :  { %22 = dma.hbm_to_vmem [thread:$0]  %s18_s17, 128, %s20_s19, [#allocation3]  }
   0x5   :  { %s486_s23 = smov [#allocation5]   ;;  %s487_s25 = smov 128  }
   0x6   :  { %s29_s24 = sshll.u32 %s486_s23, 4  ;;  %s488_s26 = smov 8   ;;  %s30_s24 = int_to_ptr.vmem [resolvable:$true] %s29_s24 }
   0x7   :  { %35 = dma.hbm_to_vmem [thread:$0]  %s28_s22, 16384, %s30_s24, [#allocation6], %s487_s25, %s487_s25, %s488_s26  }
   0x8   :  { %479 = dma.done.wait [#allocation3], 128  }
   0x9   :  { %480 = vsyncadd [#allocation3], 4294967168 }
   0xa   :  { %481 = dma.done.wait [#allocation6], 16384  }
   0xb   :  { %482 = vsyncadd [#allocation6], 4294950912  ;;  %v96_v0 = vld [vmem:[#allocation5 + $0x178] sm:$0xff]  ;;  %v95_v2 = vld [vmem:[#allocation5 + $0x170] sm:$0xff]  ;;  %s489_s28 = smov [#allocation7]   ;;  %s386_s6 = sshll.u32 %s544_s4, 4  ;;  %s387_s6 = int_to_ptr.hbm [resolvable:$true] %s386_s6 }
   0xc   :  { %v64_v1 = vld [vmem:[#allocation5 + $0x78] sm:$0xff]  ;;  %235 = vmatpush.msra.mxu2 %v96_v0  ;;  %v63_v4 = vld [vmem:[#allocation5 + $0x70] sm:$0xff]  ;;  %v94_v6 = vld [vmem:[#allocation5 + $0x168] sm:$0xff]  ;;  %s384_s29 = sshll.u32 %s489_s28, 4  ;;  %s385_s29 = int_to_ptr.vmem [resolvable:$true] %s384_s29 }
   0xd   :  { %195 = vmatpush.msra.mxu0 %v64_v1  ;;  %v112_v3 = vld [vmem:[#allocation5 + $0x1f8] sm:$0xff]  ;;  %v111_v7 = vld [vmem:[#allocation5 + $0x1f0] sm:$0xff]  ;;  %v62_v8 = vld [vmem:[#allocation5 + $0x68] sm:$0xff] }
   0xe   :  { %v80_v5 = vld [vmem:[#allocation5 + $0xf8] sm:$0xff]  ;;  %255 = vmatpush.msra.mxu3 %v112_v3  ;;  %236 = vmatpush.msra.mxu2 %v95_v2  ;;  %v79_v9 = vld [vmem:[#allocation5 + $0xf0] sm:$0xff]  ;;  %v110_v10 = vld [vmem:[#allocation5 + $0x1e8] sm:$0xff] }
   0xf   :  { %215 = vmatpush.msra.mxu1 %v80_v5  ;;  %196 = vmatpush.msra.mxu0 %v63_v4  ;;  %v93_v11 = vld [vmem:[#allocation5 + $0x160] sm:$0xff]  ;;  %v78_v13 = vld [vmem:[#allocation5 + $0xe8] sm:$0xff]  ;;  %v92_v16 = vld [vmem:[#allocation5 + $0x158] sm:$0xff] }
  0x10   :  { %256 = vmatpush.msra.mxu3 %v111_v7  ;;  %v61_v12 = vld [vmem:[#allocation5 + $0x60] sm:$0xff]  ;;  %237 = vmatpush.msra.mxu2 %v94_v6  ;;  %v60_v17 = vld [vmem:[#allocation5 + $0x58] sm:$0xff]  ;;  %v91_v20 = vld [vmem:[#allocation5 + $0x150] sm:$0xff] }
  0x11   :  { %216 = vmatpush.msra.mxu1 %v79_v9  ;;  %197 = vmatpush.msra.mxu0 %v62_v8  ;;  %v109_v14 = vld [vmem:[#allocation5 + $0x1e0] sm:$0xff]  ;;  %v108_v18 = vld [vmem:[#allocation5 + $0x1d8] sm:$0xff]  ;;  %v59_v21 = vld [vmem:[#allocation5 + $0x50] sm:$0xff] }
  0x12   :  { %v77_v15 = vld [vmem:[#allocation5 + $0xe0] sm:$0xff]  ;;  %257 = vmatpush.msra.mxu3 %v110_v10  ;;  %238 = vmatpush.msra.mxu2 %v93_v11  ;;  %v76_v19 = vld [vmem:[#allocation5 + $0xd8] sm:$0xff]  ;;  %v107_v22 = vld [vmem:[#allocation5 + $0x1d0] sm:$0xff] }
  0x13   :  { %217 = vmatpush.msra.mxu1 %v78_v13  ;;  %198 = vmatpush.msra.mxu0 %v61_v12  ;;  %v75_v23 = vld [vmem:[#allocation5 + $0xd0] sm:$0xff]  ;;  %v90_v24 = vld [vmem:[#allocation5 + $0x148] sm:$0xff]  ;;  %v89_v28 = vld [vmem:[#allocation5 + $0x140] sm:$0xff] }
  0x14   :  { %258 = vmatpush.msra.mxu3 %v109_v14  ;;  %239 = vmatpush.msra.mxu2 %v92_v16  ;;  %v58_v25 = vld [vmem:[#allocation5 + $0x48] sm:$0xff]  ;;  %v57_v29 = vld [vmem:[#allocation5 + $0x40] sm:$0xff]  ;;  %v88_v32 = vld [vmem:[#allocation5 + $0x138] sm:$0xff] }
  0x15   :  { %218 = vmatpush.msra.mxu1 %v77_v15  ;;  %199 = vmatpush.msra.mxu0 %v60_v17  ;;  %v106_v26 = vld [vmem:[#allocation5 + $0x1c8] sm:$0xff]  ;;  %v105_v30 = vld [vmem:[#allocation5 + $0x1c0] sm:$0xff]  ;;  %v56_v33 = vld [vmem:[#allocation5 + $0x38] sm:$0xff] }
  0x16   :  { %259 = vmatpush.msra.mxu3 %v108_v18  ;;  %240 = vmatpush.msra.mxu2 %v91_v20  ;;  %v74_v27 = vld [vmem:[#allocation5 + $0xc8] sm:$0xff]  ;;  %v73_v31 = vld [vmem:[#allocation5 + $0xc0] sm:$0xff]  ;;  %v104_v34 = vld [vmem:[#allocation5 + $0x1b8] sm:$0xff] }
  0x17   :  { %219 = vmatpush.msra.mxu1 %v76_v19  ;;  %200 = vmatpush.msra.mxu0 %v59_v21  ;;  %v72_v35 = vld [vmem:[#allocation5 + $0xb8] sm:$0xff]  ;;  %v87_v36 = vld [vmem:[#allocation5 + $0x130] sm:$0xff]  ;;  %v86_v40 = vld [vmem:[#allocation5 + $0x128] sm:$0xff] }
  0x18   :  { %260 = vmatpush.msra.mxu3 %v107_v22  ;;  %241 = vmatpush.msra.mxu2 %v90_v24  ;;  %v55_v37 = vld [vmem:[#allocation5 + $0x30] sm:$0xff]  ;;  %v54_v41 = vld [vmem:[#allocation5 + $0x28] sm:$0xff]  ;;  %v85_v44 = vld [vmem:[#allocation5 + $0x120] sm:$0xff] }
  0x19   :  { %220 = vmatpush.msra.mxu1 %v75_v23  ;;  %201 = vmatpush.msra.mxu0 %v58_v25  ;;  %v103_v38 = vld [vmem:[#allocation5 + $0x1b0] sm:$0xff]  ;;  %v102_v42 = vld [vmem:[#allocation5 + $0x1a8] sm:$0xff]  ;;  %v53_v45 = vld [vmem:[#allocation5 + $0x20] sm:$0xff] }
  0x1a   :  { %261 = vmatpush.msra.mxu3 %v106_v26  ;;  %242 = vmatpush.msra.mxu2 %v89_v28  ;;  %v71_v39 = vld [vmem:[#allocation5 + $0xb0] sm:$0xff]  ;;  %v70_v43 = vld [vmem:[#allocation5 + $0xa8] sm:$0xff]  ;;  %v101_v46 = vld [vmem:[#allocation5 + $0x1a0] sm:$0xff] }
  0x1b   :  { %221 = vmatpush.msra.mxu1 %v74_v27  ;;  %202 = vmatpush.msra.mxu0 %v57_v29  ;;  %v69_v47 = vld [vmem:[#allocation5 + $0xa0] sm:$0xff]  ;;  %v84_v48 = vld [vmem:[#allocation5 + $0x118] sm:$0xff]  ;;  %v83_v52 = vld [vmem:[#allocation5 + $0x110] sm:$0xff] }
  0x1c   :  { %262 = vmatpush.msra.mxu3 %v105_v30  ;;  %243 = vmatpush.msra.mxu2 %v88_v32  ;;  %v52_v49 = vld [vmem:[#allocation5 + $0x18] sm:$0xff]  ;;  %v51_v53 = vld [vmem:[#allocation5 + $0x10] sm:$0xff]  ;;  %v82_v56 = vld [vmem:[#allocation5 + $0x108] sm:$0xff] }
  0x1d   :  { %222 = vmatpush.msra.mxu1 %v73_v31  ;;  %203 = vmatpush.msra.mxu0 %v56_v33  ;;  %v100_v50 = vld [vmem:[#allocation5 + $0x198] sm:$0xff]  ;;  %v99_v54 = vld [vmem:[#allocation5 + $0x190] sm:$0xff]  ;;  %v50_v57 = vld [vmem:[#allocation5 + $0x8] sm:$0xff] }
  0x1e   :  { %263 = vmatpush.msra.mxu3 %v104_v34  ;;  %244 = vmatpush.msra.mxu2 %v87_v36  ;;  %v68_v51 = vld [vmem:[#allocation5 + $0x98] sm:$0xff]  ;;  %v67_v55 = vld [vmem:[#allocation5 + $0x90] sm:$0xff]  ;;  %v98_v58 = vld [vmem:[#allocation5 + $0x188] sm:$0xff] }
  0x1f   :  { %223 = vmatpush.msra.mxu1 %v72_v35  ;;  %204 = vmatpush.msra.mxu0 %v55_v37  ;;  %v66_v59 = vld [vmem:[#allocation5 + $0x88] sm:$0xff]  ;;  %v81_v60 = vld [vmem:[#allocation5 + $0x100] sm:$0xff]  ;;  %v160_v62 = vld [vmem:[#allocation5 + $0x378] sm:$0xff] }
  0x20   :  { %264 = vmatpush.msra.mxu3 %v103_v38  ;;  %245 = vmatpush.msra.mxu2 %v86_v40  ;;  %v49_v61 = vld [vmem:[#allocation5] sm:$0xff]  ;;  %v128_v0 = vld [vmem:[#allocation5 + $0x278] sm:$0xff]  ;;  %v159_v2 = vld [vmem:[#allocation5 + $0x370] sm:$0xff] }
  0x21   :  { %224 = vmatpush.msra.mxu1 %v71_v39  ;;  %205 = vmatpush.msra.mxu0 %v54_v41  ;;  %v97_v63 = vld [vmem:[#allocation5 + $0x180] sm:$0xff]  ;;  %v176_v1 = vld [vmem:[#allocation5 + $0x3f8] sm:$0xff]  ;;  %v127_v4 = vld [vmem:[#allocation5 + $0x270] sm:$0xff] }
  0x22   :  { %265 = vmatpush.msra.mxu3 %v102_v42  ;;  %246 = vmatpush.msra.mxu2 %v85_v44  ;;  %v65_v3 = vld [vmem:[#allocation5 + $0x80] sm:$0xff]  ;;  %v144_v5 = vld [vmem:[#allocation5 + $0x2f8] sm:$0xff]  ;;  %v158_v6 = vld [vmem:[#allocation5 + $0x368] sm:$0xff] }
  0x23   :  { %225 = vmatpush.msra.mxu1 %v70_v43  ;;  %206 = vmatpush.msra.mxu0 %v53_v45  ;;  %v175_v7 = vld [vmem:[#allocation5 + $0x3f0] sm:$0xff]  ;;  %v126_v8 = vld [vmem:[#allocation5 + $0x268] sm:$0xff]  ;;  %v157_v10 = vld [vmem:[#allocation5 + $0x360] sm:$0xff] }
  0x24   :  { %266 = vmatpush.msra.mxu3 %v101_v46  ;;  %247 = vmatpush.msra.mxu2 %v84_v48  ;;  %v143_v9 = vld [vmem:[#allocation5 + $0x2f0] sm:$0xff]  ;;  %v174_v11 = vld [vmem:[#allocation5 + $0x3e8] sm:$0xff]  ;;  %v125_v12 = vld [vmem:[#allocation5 + $0x260] sm:$0xff] }
  0x25   :  { %226 = vmatpush.msra.mxu1 %v69_v47  ;;  %207 = vmatpush.msra.mxu0 %v52_v49  ;;  %v142_v13 = vld [vmem:[#allocation5 + $0x2e8] sm:$0xff]  ;;  %v156_v14 = vld [vmem:[#allocation5 + $0x358] sm:$0xff]  ;;  %v173_v15 = vld [vmem:[#allocation5 + $0x3e0] sm:$0xff] }
  0x26   :  { %267 = vmatpush.msra.mxu3 %v100_v50  ;;  %248 = vmatpush.msra.mxu2 %v83_v52  ;;  %v124_v16 = vld [vmem:[#allocation5 + $0x258] sm:$0xff]  ;;  %v141_v17 = vld [vmem:[#allocation5 + $0x2e0] sm:$0xff]  ;;  %v155_v18 = vld [vmem:[#allocation5 + $0x350] sm:$0xff] }
  0x27   :  { %227 = vmatpush.msra.mxu1 %v68_v51  ;;  %208 = vmatpush.msra.mxu0 %v51_v53  ;;  %v172_v19 = vld [vmem:[#allocation5 + $0x3d8] sm:$0xff]  ;;  %v123_v20 = vld [vmem:[#allocation5 + $0x250] sm:$0xff]  ;;  %v154_v22 = vld [vmem:[#allocation5 + $0x348] sm:$0xff] }
  0x28   :  { %268 = vmatpush.msra.mxu3 %v99_v54  ;;  %249 = vmatpush.msra.mxu2 %v82_v56  ;;  %v140_v21 = vld [vmem:[#allocation5 + $0x2d8] sm:$0xff]  ;;  %v171_v23 = vld [vmem:[#allocation5 + $0x3d0] sm:$0xff]  ;;  %v122_v24 = vld [vmem:[#allocation5 + $0x248] sm:$0xff] }
  0x29   :  { %228 = vmatpush.msra.mxu1 %v67_v55  ;;  %209 = vmatpush.msra.mxu0 %v50_v57  ;;  %v139_v25 = vld [vmem:[#allocation5 + $0x2d0] sm:$0xff]  ;;  %v153_v26 = vld [vmem:[#allocation5 + $0x340] sm:$0xff]  ;;  %v170_v27 = vld [vmem:[#allocation5 + $0x3c8] sm:$0xff] }
  0x2a   :  { %269 = vmatpush.msra.mxu3 %v98_v58  ;;  %250 = vmatpush.msra.mxu2 %v81_v60  ;;  %v121_v28 = vld [vmem:[#allocation5 + $0x240] sm:$0xff]  ;;  %v138_v29 = vld [vmem:[#allocation5 + $0x2c8] sm:$0xff]  ;;  %v152_v30 = vld [vmem:[#allocation5 + $0x338] sm:$0xff] }
  0x2b   :  { %229 = vmatpush.msra.mxu1 %v66_v59  ;;  %210 = vmatpush.msra.mxu0 %v49_v61  ;;  %v169_v31 = vld [vmem:[#allocation5 + $0x3c0] sm:$0xff]  ;;  %v120_v32 = vld [vmem:[#allocation5 + $0x238] sm:$0xff]  ;;  %v151_v34 = vld [vmem:[#allocation5 + $0x330] sm:$0xff] }
  0x2c   :  { %315 = vmatpush.msrb.mxu2 %v160_v62  ;;  %270 = vmatpush.msra.mxu3 %v97_v63  ;;  %v137_v33 = vld [vmem:[#allocation5 + $0x2c0] sm:$0xff]  ;;  %v168_v35 = vld [vmem:[#allocation5 + $0x3b8] sm:$0xff]  ;;  %v119_v36 = vld [vmem:[#allocation5 + $0x230] sm:$0xff] }
  0x2d   :  { %275 = vmatpush.msrb.mxu0 %v128_v0  ;;  %230 = vmatpush.msra.mxu1 %v65_v3  ;;  %v136_v37 = vld [vmem:[#allocation5 + $0x2b8] sm:$0xff]  ;;  %v150_v39 = vld [vmem:[#allocation5 + $0x328] sm:$0xff]  ;;  %v167_v40 = vld [vmem:[#allocation5 + $0x3b0] sm:$0xff] }
  0x2e   :  { %335 = vmatpush.msrb.mxu3 %v176_v1  ;;  %316 = vmatpush.msrb.mxu2 %v159_v2  ;;  %v521_v38 = vld [vmem:[#allocation2] sm:$0xff]  ;;  %v118_v41 = vld [vmem:[#allocation5 + $0x228] sm:$0xff]  ;;  %v135_v42 = vld [vmem:[#allocation5 + $0x2b0] sm:$0xff] }
  0x2f   :  { %276 = vmatpush.msrb.mxu0 %v127_v4  ;;  %295 = vmatpush.msrb.mxu1 %v144_v5  ;;  %v149_v43 = vld [vmem:[#allocation5 + $0x320] sm:$0xff]  ;;  %v166_v44 = vld [vmem:[#allocation5 + $0x3a8] sm:$0xff]  ;;  %v181_v45 = vperm.slane %v521_v38, 2  ;;  %v148_v48 = vld [vmem:[#allocation5 + $0x318] sm:$0xff]  ;;  %v179_v49 = vperm.slane %v521_v38, 0  ;;  %v182_v51 = vperm.slane %v521_v38, 3 }
  0x30   :  { %317 = vmatpush.msrb.mxu2 %v158_v6  ;;  %336 = vmatpush.msrb.mxu3 %v175_v7  ;;  %v117_v46 = vld [vmem:[#allocation5 + $0x220] sm:$0xff]  ;;  %v134_v47 = vld [vmem:[#allocation5 + $0x2a8] sm:$0xff]  ;;  %v116_v52 = vld [vmem:[#allocation5 + $0x218] sm:$0xff]  ;;  %v180_v55 = vperm.slane %v521_v38, 1  ;;  %v185_v1 = vperm.slane %v521_v38, 6  ;;  %v183_v5 = vperm.slane %v521_v38, 4 }
  0x31   :  { %277 = vmatpush.msrb.mxu0 %v126_v8  ;;  %296 = vmatpush.msrb.mxu1 %v143_v9  ;;  %v165_v50 = vld [vmem:[#allocation5 + $0x3a0] sm:$0xff]  ;;  %v147_v54 = vld [vmem:[#allocation5 + $0x310] sm:$0xff]  ;;  %v164_v56 = vld [vmem:[#allocation5 + $0x398] sm:$0xff]  ;;  %v186_v6 = vperm.slane %v521_v38, 7  ;;  %v184_v8 = vperm.slane %v521_v38, 5 }
  0x32   :  { %318 = vmatpush.msrb.mxu2 %v157_v10  ;;  %337 = vmatpush.msrb.mxu3 %v174_v11  ;;  %v133_v53 = vld [vmem:[#allocation5 + $0x2a0] sm:$0xff]  ;;  %v115_v57 = vld [vmem:[#allocation5 + $0x210] sm:$0xff]  ;;  %v132_v58 = vld [vmem:[#allocation5 + $0x298] sm:$0xff] }
  0x33   :  { %278 = vmatpush.msrb.mxu0 %v125_v12  ;;  %297 = vmatpush.msrb.mxu1 %v142_v13  ;;  %v146_v59 = vld [vmem:[#allocation5 + $0x308] sm:$0xff]  ;;  %v163_v60 = vld [vmem:[#allocation5 + $0x390] sm:$0xff]  ;;  %v145_v63 = vld [vmem:[#allocation5 + $0x300] sm:$0xff] }
  0x34   :  { %319 = vmatpush.msrb.mxu2 %v156_v14  ;;  %338 = vmatpush.msrb.mxu3 %v173_v15  ;;  %v114_v61 = vld [vmem:[#allocation5 + $0x208] sm:$0xff]  ;;  %v131_v62 = vld [vmem:[#allocation5 + $0x290] sm:$0xff]  ;;  %v113_v2 = vld [vmem:[#allocation5 + $0x200] sm:$0xff] }
  0x35   :  { %279 = vmatpush.msrb.mxu0 %v124_v16  ;;  %298 = vmatpush.msrb.mxu1 %v141_v17  ;;  %v162_v0 = vld [vmem:[#allocation5 + $0x388] sm:$0xff]  ;;  %v161_v4 = vld [vmem:[#allocation5 + $0x380] sm:$0xff]  ;;  %v177_v9 = vld [vmem:[%s542_s2] sm:$0x1] }
  0x36   :  { %320 = vmatpush.msrb.mxu2 %v155_v18  ;;  %339 = vmatpush.msrb.mxu3 %v172_v19  ;;  %v130_v3 = vld [vmem:[#allocation5 + $0x288] sm:$0xff]  ;;  %v129_v7 = vld [vmem:[#allocation5 + $0x280] sm:$0xff] }
  0x37   :  { %280 = vmatpush.msrb.mxu0 %v123_v20  ;;  %299 = vmatpush.msrb.mxu1 %v140_v21 }
  0x38   :  { %321 = vmatpush.msrb.mxu2 %v154_v22  ;;  %340 = vmatpush.msrb.mxu3 %v171_v23 }
  0x39   :  { %281 = vmatpush.msrb.mxu0 %v122_v24  ;;  %300 = vmatpush.msrb.mxu1 %v139_v25 }
  0x3a   :  { %322 = vmatpush.msrb.mxu2 %v153_v26  ;;  %341 = vmatpush.msrb.mxu3 %v170_v27 }
  0x3b   :  { %282 = vmatpush.msrb.mxu0 %v121_v28  ;;  %301 = vmatpush.msrb.mxu1 %v138_v29 }
  0x3c   :  { %323 = vmatpush.msrb.mxu2 %v152_v30  ;;  %342 = vmatpush.msrb.mxu3 %v169_v31 }
  0x3d   :  { %283 = vmatpush.msrb.mxu0 %v120_v32  ;;  %302 = vmatpush.msrb.mxu1 %v137_v33  ;;  %v355_v33 = vld [vmem:[%s543_s3] sm:$0x1] }
  0x3e   :  { %324 = vmatpush.msrb.mxu2 %v151_v34  ;;  %343 = vmatpush.msrb.mxu3 %v168_v35  ;;  %vm356_vm2 = vcmp.ne.s32.totalorder %v355_v33, 0 }
  0x3f   :  { %284 = vmatpush.msrb.mxu0 %v119_v36  ;;  %303 = vmatpush.msrb.mxu1 %v136_v37 }
  0x40   :  { %325 = vmatpush.msrb.mxu2 %v150_v39  ;;  %344 = vmatpush.msrb.mxu3 %v167_v40 }
  0x41   :  { %285 = vmatpush.msrb.mxu0 %v118_v41  ;;  %304 = vmatpush.msrb.mxu1 %v135_v42 }
  0x42   :  { %326 = vmatpush.msrb.mxu2 %v149_v43  ;;  %345 = vmatpush.msrb.mxu3 %v166_v44 }
  0x43   :  { %251 = vmatmul.f32.vlgmr.msra.gmra.mxu2 %v181_v45  ;;  %286 = vmatpush.msrb.mxu0 %v117_v46 }
  0x44   :  { %305 = vmatpush.msrb.mxu1 %v134_v47  ;;  %327 = vmatpush.msrb.mxu2 %v148_v48 }
  0x45   :  { %346 = vmatpush.msrb.mxu3 %v165_v50  ;;  %211 = vmatmul.f32.vlgmr.msra.gmra.mxu0 %v179_v49 }
  0x46   :  { %271 = vmatmul.f32.vlgmr.msra.gmra.mxu3 %v182_v51  ;;  %287 = vmatpush.msrb.mxu0 %v116_v52 }
  0x47   :  { %306 = vmatpush.msrb.mxu1 %v133_v53  ;;  %328 = vmatpush.msrb.mxu2 %v147_v54 }
  0x48   :  { %347 = vmatpush.msrb.mxu3 %v164_v56  ;;  %231 = vmatmul.f32.vlgmr.msra.gmra.mxu1 %v180_v55 }
  0x49   :  { %288 = vmatpush.msrb.mxu0 %v115_v57  ;;  %307 = vmatpush.msrb.mxu1 %v132_v58 }
  0x4a   :  { %329 = vmatpush.msrb.mxu2 %v146_v59  ;;  %348 = vmatpush.msrb.mxu3 %v163_v60 }
  0x4b   :  { %289 = vmatpush.msrb.mxu0 %v114_v61  ;;  %308 = vmatpush.msrb.mxu1 %v131_v62 }
  0x4c   :  { %330 = vmatpush.msrb.mxu2 %v145_v63  ;;  %349 = vmatpush.msrb.mxu3 %v162_v0 }
  0x4d   :  { %331 = vmatmul.f32.vlgmr.msrb.gmra.mxu2 %v185_v1  ;;  %290 = vmatpush.msrb.mxu0 %v113_v2 }
  0x4e   :  { %309 = vmatpush.msrb.mxu1 %v130_v3  ;;  %350 = vmatpush.msrb.mxu3 %v161_v4 }
  0x4f   :  { %291 = vmatmul.f32.vlgmr.msrb.gmra.mxu0 %v183_v5  ;;  %351 = vmatmul.f32.vlgmr.msrb.gmra.mxu3 %v186_v6 }
  0x50   :  { %310 = vmatpush.msrb.mxu1 %v129_v7 }
  0x51   :  { %311 = vmatmul.f32.vlgmr.msrb.gmra.mxu1 %v184_v8 }
  0xc2   :  { %v212_v10 = vpop.f32.mrf.mxu0 }
  0xc3   :  { %v213_v11 = vadd.f32 %v212_v10, %v177_v9 }
  0xc5   :  { %v232_v12 = vpop.f32.mrf.mxu1 }
  0xc6   :  { %v233_v13 = vadd.f32 %v232_v12, %v213_v11  ;;  %v252_v14 = vpop.f32.mrf.mxu2 }
  0xc8   :  { %v253_v15 = vadd.f32 %v252_v14, %v233_v13 }
  0xc9   :  { %v272_v16 = vpop.f32.mrf.mxu3 }
  0xca   :  { %v273_v17 = vadd.f32 %v272_v16, %v253_v15 }
  0xcc   :  { %v292_v18 = vpop.f32.mrf.mxu0 }
  0xcd   :  { %v293_v19 = vadd.f32 %v292_v18, %v273_v17 }
  0xce   :  { %v312_v20 = vpop.f32.mrf.mxu1 }
  0xcf   :  { %v313_v21 = vadd.f32 %v312_v20, %v293_v19 }
  0xd0   :  { %v332_v22 = vpop.f32.mrf.mxu2 }
  0xd1   :  { %v333_v23 = vadd.f32 %v332_v22, %v313_v21 }
  0xd2   :  { %v352_v24 = vpop.f32.mrf.mxu3 }
  0xd3   :  { %v353_v25 = vadd.f32 %v352_v24, %v333_v23 }
  0xd5   :  { %v397_v26 = vmul.f32 -1.442695, %v353_v25  ;;  %v376_v38 = vmax.f32 %v353_v25, 0.0 }
  0xd7   :  { %403 = vpow2.f32 %v397_v26 }
  0xdd   :  { %v404_v27 = vpop.eup %403 }
  0xde   :  { %v360_v28 = vadd.f32 1.0, %v404_v27 }
  0xe0   :  { %405 = vrcp.f32 %v360_v28  ;;  %v372_v32 = vand.u32 2147483648, %v360_v28  ;;  %v370_v35 = vand.u32 2147483647, %v360_v28  ;;  %vm366_vm1 = vweird.f32 %v360_v28 }
  0xe2   :  { %v373_v37 = vor.u32 1.1754944e-38, %v372_v32  ;;  %vm371_vm4 = vcmp.eq.f32.partialorder %v370_v35, 8.507059e+37 }
  0xe6   :  { %v406_v29 = vpop.eup %405 }
  0xe7   :  { %v362_v30 = vmul.f32 %v406_v29, %v360_v28  ;;  %vm367_vm0 = vweird.f32 %v406_v29 }
  0xe8   :  { %vm368_vm3 = vmor %vm366_vm1, %vm367_vm0 }
  0xe9   :  { %v363_v31 = vsub.f32 1.0, %v362_v30 }
  0xeb   :  { %v364_v34 = vmul.f32 %v406_v29, %v363_v31 }
  0xed   :  { %v365_v36 = vadd.f32 %v406_v29, %v364_v34 }
  0xef   :  { %v369_v39 = vsel %vm368_vm3, %v406_v29, %v365_v36 }
  0xf0   :  { %v374_v40 = vsel %vm371_vm4, %v373_v37, %v369_v39 }
  0xf1   :  { %v377_v41 = vsel %vm356_vm2, %v374_v40, %v376_v38 }
  0xf2   :  { %378 = vst [vmem:[#allocation7] sm:$0x1] %v377_v41 }
  0xf3   :  { %389 = dma.vmem_to_hbm [thread:$0]  %s385_s29, 16, %s387_s6, [#allocation4]  }
  0xf4   :  { %483 = dma.done.wait [#allocation4], 16  }
  0xf5   :  { %484 = vsyncadd [#allocation4], 4294967280 }
  0xf6   :  { %394 = vsyncpa [#allocation3], 1 }
  0xf7   :  { %395 = vsyncpa [#allocation6], 1 }
  0xf8   :  { %396 = vsyncpa [#allocation4], 1 }

</bundles_post_ra>
